<compile_context>
chip_gen: v7x
topology: tpu7x:2x2x1
jax: 0.10.0
libtpu: 0.0.40
codegen_flags: <defaults>
</compile_context>

<pallas_src>
import math

import jax
import jax.numpy as jnp
from jax.experimental import pallas as pl
from jax.experimental.pallas import tpu as pltpu


def _fusion_kernel(params_ref, var_ref, gmm_ref, out_ref):
    # params_ref: SMEM (3,) f32 -> [w0, w1, bias] of nn.Linear(2, 1)
    # Hoist the scalar reads once; do NOT re-read per vector chunk.
    w0 = params_ref[0]
    w1 = params_ref[1]
    b = params_ref[2]

    var = var_ref[...].astype(jnp.float32)
    gmm = gmm_ref[...].astype(jnp.float32)

    # Linear(2,1) over stacked (var, gmm) + sigmoid -> fusion weight.
    weight = jax.nn.sigmoid(w0 * var + w1 * gmm + b)

    # weight*var + (1-weight)*gmm  ==  gmm + weight*(var - gmm)  (1 fewer mul)
    out_ref[...] = (gmm + weight * (var - gmm)).astype(out_ref.dtype)


def _default_tile_rows():
    """Per-generation default row tile (HBM-bound streaming kernel)."""
    try:
        kind = jax.devices()[0].device_kind.lower()
    except Exception:  # pragma: no cover - defensive
        return 512
    # v5e (and older): 16 MiB default scoped VMEM -> 3 streams x 2 bufs x 2 MiB.
    if "v2" in kind or "v3" in kind or "v4" in kind or "v5" in kind:
        return 512
    # v6e / v7x: 32 MiB default scoped VMEM -> up to 24 MiB double-buffered.
    return 1024


def confidence_fusion(variance_conf, gmm_conf, fc_weight, fc_bias,
                      *, lanes=1024, tile_rows=None):
    """variance_conf, gmm_conf: [B, T, C] (f32 or bf16). fc_weight: [1, 2],
    fc_bias: [1].

    `lanes` is the maximum lane width (multiple of 128); the actual lane width
    is the largest multiple of 128 <= lanes that divides B*T*C (no padding),
    falling back to padding only the final partial row.  `tile_rows` sizes the
    pipelined block; defaults per TPU generation.
    """
    assert variance_conf.shape == gmm_conf.shape
    assert variance_conf.dtype == gmm_conf.dtype
    assert lanes >= 128 and lanes % 128 == 0

    orig_shape = variance_conf.shape
    dtype = variance_conf.dtype
    n = math.prod(orig_shape)

    if tile_rows is None:
        tile_rows = _default_tile_rows()

    # Sublane packing: 8 rows/vreg for 4-byte, 16 for 2-byte dtypes.
    pack = max(8, 32 // dtype.itemsize)

    # --- lane-dense layout -------------------------------------------------
    # Prefer a lane width that divides n exactly: reshape is then free (no
    # wrapper-side pad / slice copies).  Otherwise pad only the last row.
    lanes_eff = None
    for cand in range(lanes, 0, -128):
        if n % cand == 0:
            lanes_eff = cand
            break
    padded = lanes_eff is None
    if padded:
        lanes_eff = lanes

    rows = pl.cdiv(n, lanes_eff)
    n_slab = rows * lanes_eff

    var_flat = variance_conf.reshape(-1)
    gmm_flat = gmm_conf.reshape(-1)
    if padded:
        # Ragged tail: pad at most lanes_eff-1 zeros to complete the last row.
        var_flat = jnp.pad(var_flat, (0, n_slab - n))
        gmm_flat = jnp.pad(gmm_flat, (0, n_slab - n))
    var2d = var_flat.reshape(rows, lanes_eff)
    gmm2d = gmm_flat.reshape(rows, lanes_eff)

    # --- row tile / grid ---------------------------------------------------
    if rows <= tile_rows and rows < 2 * pack:
        # Tiny input: one full-extent block (exempt from the pack-multiple rule).
        tile_rows_eff = rows
    else:
        # Multiple of the sublane pack, and small enough that the 1-D grid has
        # >= 2 balanced steps (so v7x's two TensorCores both get work).
        t = max(pack, (tile_rows // pack) * pack)
        half = pack * pl.cdiv(pl.cdiv(rows, 2), pack)
        tile_rows_eff = min(t, half)
    grid = (pl.cdiv(rows, tile_rows_eff),)  # tail block masked by Pallas

    # Pack Linear params into a tiny SMEM scalar vector: [w0, w1, bias].
    params = jnp.concatenate(
        [fc_weight.reshape(-1).astype(jnp.float32),
         fc_bias.reshape(-1).astype(jnp.float32)]
    )  # shape (3,)

    out2d = pl.pallas_call(
        _fusion_kernel,
        out_shape=jax.ShapeDtypeStruct((rows, lanes_eff), dtype),
        grid_spec=pltpu.PrefetchScalarGridSpec(
            num_scalar_prefetch=0,
            grid=grid,
            in_specs=[
                pl.BlockSpec(memory_space=pltpu.MemorySpace.SMEM),      # params
                pl.BlockSpec((tile_rows_eff, lanes_eff), lambda i: (i, 0)),  # var
                pl.BlockSpec((tile_rows_eff, lanes_eff), lambda i: (i, 0)),  # gmm
            ],
            out_specs=pl.BlockSpec((tile_rows_eff, lanes_eff), lambda i: (i, 0)),
        ),
        compiler_params=pltpu.CompilerParams(
            # Row axis is fully independent -> shard across TCs on v7x.
            dimension_semantics=("parallel",),
        ),
    )(params, var2d, gmm2d)

    out_flat = out2d.reshape(-1)
    if padded:
        out_flat = out_flat[:n]
    return out_flat.reshape(orig_shape)


def _reference(variance_conf, gmm_conf, fc_weight, fc_bias):
    # Pure-JAX reference mirroring the PyTorch forward (computed in f32).
    var = variance_conf.astype(jnp.float32)
    gmm = gmm_conf.astype(jnp.float32)
    x = jnp.stack([var, gmm], axis=-1)                            # [B,T,C,2]
    logit = jnp.einsum("btcf,of->btco", x, fc_weight) + fc_bias   # [B,T,C,1]
    weight = jax.nn.sigmoid(logit)[..., 0]                        # [B,T,C]
    return weight * var + (1.0 - weight) * gmm


if __name__ == "__main__":
    key = jax.random.PRNGKey(0)
    k1, k2, k3, k4 = jax.random.split(key, 4)

    # Deterministic Linear(2, 1) params (synthetic init, Kaiming-uniform-ish).
    fc_weight = jax.random.uniform(k3, (1, 2), dtype=jnp.float32,
                                   minval=-0.7071, maxval=0.7071)
    fc_bias = jax.random.uniform(k4, (1,), dtype=jnp.float32,
                                 minval=-0.7071, maxval=0.7071)

    # --- case 1: small shape consistent with the module (no padding path) ---
    B, T, C = 2, 8, 32
    variance_conf = jax.random.uniform(k1, (B, T, C), dtype=jnp.float32)
    gmm_conf = jax.random.uniform(k2, (B, T, C), dtype=jnp.float32)

    out = confidence_fusion(variance_conf, gmm_conf, fc_weight, fc_bias)
    out = jax.block_until_ready(out)
    ref = _reference(variance_conf, gmm_conf, fc_weight, fc_bias)
    assert out.shape == (B, T, C)
    assert jnp.allclose(out, ref, atol=1e-5, rtol=1e-5)

    # --- case 2: ragged size -> last-row padding + multi-step grid ---------
    k5, k6 = jax.random.split(k1)
    B2, T2, C2 = 3, 37, 129
    var2 = jax.random.uniform(k5, (B2, T2, C2), dtype=jnp.float32)
    gmm2 = jax.random.uniform(k6, (B2, T2, C2), dtype=jnp.float32)
    out2 = confidence_fusion(var2, gmm2, fc_weight, fc_bias,
                             lanes=128, tile_rows=16)
    out2 = jax.block_until_ready(out2)
    ref2 = _reference(var2, gmm2, fc_weight, fc_bias)
    assert out2.shape == (B2, T2, C2)
    assert jnp.allclose(out2, ref2, atol=1e-5, rtol=1e-5)

    # --- case 3: bf16 end-to-end, multi-step grid with a masked tail block --
    k7, k8 = jax.random.split(k2)
    B3, T3, C3 = 2, 72, 128   # n = 18432 -> lanes 1024, rows 18, tile 16, grid 2
    var3 = jax.random.uniform(k7, (B3, T3, C3), dtype=jnp.float32).astype(jnp.bfloat16)
    gmm3 = jax.random.uniform(k8, (B3, T3, C3), dtype=jnp.float32).astype(jnp.bfloat16)
    out3 = confidence_fusion(var3, gmm3, fc_weight, fc_bias)
    out3 = jax.block_until_ready(out3)
    ref3 = _reference(var3, gmm3, fc_weight, fc_bias)
    assert out3.shape == (B3, T3, C3)
    assert out3.dtype == jnp.bfloat16
    assert jnp.allclose(out3.astype(jnp.float32), ref3, atol=2e-2, rtol=2e-2)

    print("KERNEL_OK")
</pallas_src>

<mosaic_0001>
module attributes {stable_mosaic.version = 11 : i64} {
  func.func @_fusion_kernel(%arg0: i32, %arg1: memref<3xf32, #tpu.memory_space<smem>>, %arg2: memref<1x512xf32, #tpu.memory_space<vmem>>, %arg3: memref<1x512xf32, #tpu.memory_space<vmem>>, %arg4: memref<1x512xf32, #tpu.memory_space<vmem>>) attributes {dimension_semantics = [#tpu.dimension_semantics<parallel>], iteration_bounds = array<i64: 1>, scalar_prefetch = 0 : i64, scratch_operands = 0 : i64, tpu.core_type = #tpu.core_type<tc>, window_params = [{transform_indices = @transform_0, window_bounds = array<i64: 3>}, {transform_indices = @transform_1, window_bounds = array<i64: 1, 512>}, {transform_indices = @transform_2, window_bounds = array<i64: 1, 512>}, {transform_indices = @transform_3, window_bounds = array<i64: 1, 512>}]} {
    %c0 = arith.constant 0 : index
    %0 = memref.load %arg1[%c0] : memref<3xf32, #tpu.memory_space<smem>>
    %c1 = arith.constant 1 : index
    %1 = memref.load %arg1[%c1] : memref<3xf32, #tpu.memory_space<smem>>
    %c2 = arith.constant 2 : index
    %2 = memref.load %arg1[%c2] : memref<3xf32, #tpu.memory_space<smem>>
    %c0_0 = arith.constant 0 : index
    %c0_1 = arith.constant 0 : index
    %3 = vector.load %arg2[%c0_0, %c0_1] : memref<1x512xf32, #tpu.memory_space<vmem>>, vector<1x512xf32>
    %c0_2 = arith.constant 0 : index
    %c0_3 = arith.constant 0 : index
    %4 = vector.load %arg3[%c0_2, %c0_3] : memref<1x512xf32, #tpu.memory_space<vmem>>, vector<1x512xf32>
    %5 = vector.broadcast %0 : f32 to vector<1x512xf32>
    %6 = arith.mulf %5, %3 : vector<1x512xf32>
    %7 = vector.broadcast %1 : f32 to vector<1x512xf32>
    %8 = arith.mulf %7, %4 : vector<1x512xf32>
    %9 = arith.addf %6, %8 : vector<1x512xf32>
    %10 = vector.broadcast %2 : f32 to vector<1x512xf32>
    %11 = arith.addf %9, %10 : vector<1x512xf32>
    %12 = arith.negf %11 : vector<1x512xf32>
    %13 = math.exp %12 : vector<1x512xf32>
    %cst = arith.constant 1.000000e+00 : f32
    %14 = vector.broadcast %cst : f32 to vector<1x512xf32>
    %15 = arith.addf %14, %13 : vector<1x512xf32>
    %16 = arith.divf %14, %15 : vector<1x512xf32>
    %17 = arith.subf %3, %4 : vector<1x512xf32>
    %18 = arith.mulf %16, %17 : vector<1x512xf32>
    %19 = arith.addf %4, %18 : vector<1x512xf32>
    %c0_4 = arith.constant 0 : index
    %c0_5 = arith.constant 0 : index
    %20 = vector.load %arg4[%c0_4, %c0_5] : memref<1x512xf32, #tpu.memory_space<vmem>>, vector<1x512xf32>
    tpu.vector_store %arg4[%c0_4, %c0_5], %19 {strides = array<i32>} : memref<1x512xf32, #tpu.memory_space<vmem>>, vector<1x512xf32>,
    return
  }
  func.func @transform_0(%arg0: i32) -> i32 {
    %c0_i32 = arith.constant 0 : i32
    %c0_i32_0 = arith.constant 0 : i32
    return %c0_i32 : i32
  }
  func.func @transform_1(%arg0: i32) -> (i32, i32) {
    %c0_i32 = arith.constant 0 : i32
    %c0_i32_0 = arith.constant 0 : i32
    return %arg0, %c0_i32 : i32, i32
  }
  func.func @transform_2(%arg0: i32) -> (i32, i32) {
    %c0_i32 = arith.constant 0 : i32
    %c0_i32_0 = arith.constant 0 : i32
    return %arg0, %c0_i32 : i32, i32
  }
  func.func @transform_3(%arg0: i32) -> (i32, i32) {
    %c0_i32 = arith.constant 0 : i32
    %c0_i32_0 = arith.constant 0 : i32
    return %arg0, %c0_i32 : i32, i32
  }
}

</mosaic_0001>

<bundles_post_ra>
// kernel: tpu_custom_call.1
= control target key start
LH: loop header
LB: loop body
LE: loop exit
PB: predicated region body
PF: predicated region fallthrough
CT: control target
= control target key end

     0   :  { %8 = vsyncpa [#allocation5], 0  ;;  %s212_s0 = inlined_call_operand.hbm [shape: f32[3], index: 0, kind: input, shape index: {}]   ;;  %s213_s1 = inlined_call_operand.hbm [shape: f32[1,512], index: 1, kind: input, shape index: {}]   ;;  %s214_s2 = inlined_call_operand.vmem [shape: f32[1,512], index: 2, kind: input, shape index: {}]   ;;  %s215_s3 = inlined_call_operand.hbm [shape: f32[1,512], index: 3, kind: output, shape index: {}]  }
   0x1   :  { %9 = vsyncpa [#allocation3], 0 }
   0x2   :  { %10 = vsyncpa [#allocation4], 0  ;;  %s90_s14 = scalar_lea.hbm %s212_s0, 16 }
   0x3   :  { %p91_p0 = scmp.ne.s32.totalorder %s212_s0, %s90_s14  ;;  %p94_p1 = scmp.lt.u32.totalorder %s90_s14, %s212_s0 }
   0x5   :  { %p96_p2 = pnand %p94_p1, %p91_p0 }
   0x7   :  { %99 = shalt.err (!%p96_p2)
}
   0x8   :  { %s150_s19 = smov [#allocation2]   ;;  %s151_s22 = smov [#allocation6]  }
   0x9   :  { %18 = dma.hbm_to_smem %s212_s0, 16, %s150_s19, [#allocation5]  }
   0xa   :  { %s25_s23 = sshll.u32 %s151_s22, 4  ;;  %s100_s26 = scalar_lea.hbm %s213_s1, 64  ;;  %s26_s23 = int_to_ptr.vmem [resolvable:$true] %s25_s23 }
   0xb   :  { %p101_p3 = scmp.ne.s32.totalorder %s213_s1, %s100_s26  ;;  %p104_p4 = scmp.lt.u32.totalorder %s100_s26, %s213_s1 }
   0xd   :  { %p106_p5 = pnand %p104_p4, %p101_p3 }
   0xf   :  { %109 = shalt.err (!%p106_p5)
}
  0x10   :  { %s110_s4 = scalar_lea.vmem %s26_s23, 64  ;;  %p115_p7 = scmp.lt.s32.totalorder %s26_s23, %s26_s23 }
  0x11   :  { %p111_p6 = scmp.ne.s32.totalorder %s26_s23, %s110_s4  ;;  %p116_p8 = scmp.lt.s32.totalorder %s110_s4, %s110_s4 }
  0x13   :  { %p117_p9 = por %p116_p8, %p115_p7 }
  0x15   :  { %p118_p10 = pnand %p117_p9, %p111_p6 }
  0x17   :  { %121 = shalt.err (!%p118_p10)
}
  0x18   :  { %28 = dma.hbm_to_vmem [thread:$0]  %s213_s1, 64, %s26_s23, [#allocation3]  }
  0x19   :  { %144 = dma.done.wait [#allocation5], 16  }
  0x1a   :  { %145 = vsyncadd [#allocation5], 4294967280 }
  0x1b   :  { %146 = dma.done.wait [#allocation3], 64  }
  0x1c   :  { %147 = vsyncadd [#allocation3], 4294967232 }
  0x1d   :  { %37 = sfence }
  0x1e   :  { %s38_s6 = sld [smem:[#allocation2]]  ;;  %s80_s7 = sld [smem:[#allocation2 + $0x1]]  ;;  %v41_v0 = vld [vmem:[#allocation6] sm:$0xf]  ;;  %v42_v1 = vld [vmem:[%s214_s2] sm:$0xf]  ;;  %v59_v13 = vlaneseq }
  0x1f   :  { %s81_s8 = sld [smem:[#allocation2 + $0x2]]  ;;  %v56_v12 = vsub.f32 %v41_v0, %v42_v1  ;;  %s152_s1 = smov [#allocation7]  }
  0x20   :  { %s70_s11 = sshll.u32 %s152_s1, 4  ;;  %vm61_vm0 = vcmp.lt.s32.totalorder %v59_v13, 512  ;;  %s71_s11 = int_to_ptr.vmem [resolvable:$true] %s70_s11 }
  0x21   :  { %s122_s2 = scalar_lea.vmem %s71_s11, 64  ;;  %p127_p12 = scmp.lt.s32.totalorder %s71_s11, %s71_s11 }
  0x22   :  { %p123_p11 = scmp.ne.s32.totalorder %s71_s11, %s122_s2  ;;  %p128_p13 = scmp.lt.s32.totalorder %s122_s2, %s122_s2 }
  0x24   :  { %v43_v2 = vstv %s38_s6  ;;  %v45_v3 = vstv %s80_s7  ;;  %p129_p0 = por %p128_p13, %p127_p12 }
  0x25   :  { %v44_v4 = vmul.f32 %v43_v2, %v41_v0  ;;  %v46_v5 = vmul.f32 %v45_v3, %v42_v1  ;;  %v48_v6 = vstv %s81_s8 }
  0x26   :  { %p130_p1 = pnand %p129_p0, %p123_p11 }
  0x27   :  { %v47_v7 = vadd.f32 %v46_v5, %v44_v4 }
  0x29   :  { %v49_v8 = vadd.f32 %v48_v6, %v47_v7 }
  0x2b   :  { %v82_v9 = vmul.f32 -1.442695, %v49_v8 }
  0x2d   :  { %86 = vpow2.f32 %v82_v9 }
  0x37   :  { %v87_v10 = vpop.eup %86 }
  0x38   :  { %v53_v11 = vadd.f32 1.0, %v87_v10 }
  0x3a   :  { %88 = vrcp.f32 %v53_v11 }
  0x44   :  { %v89_v14 = vpop.eup %88 }
  0x45   :  { %v57_v15 = vmul.f32 %v89_v14, %v56_v12 }
  0x47   :  { %v58_v16 = vadd.f32 %v57_v15, %v42_v1 }
  0x49   :  { %63 = vst.msk [vmem:[#allocation7] sm:$0xf] %vm61_vm0, %v58_v16 }
  0x4a   :  { %133 = shalt.err (!%p130_p1)
}
  0x4b   :  { %s134_s14 = scalar_lea.hbm %s215_s3, 64 }
  0x4c   :  { %p135_p2 = scmp.ne.s32.totalorder %s215_s3, %s134_s14  ;;  %p138_p3 = scmp.lt.u32.totalorder %s134_s14, %s215_s3 }
  0x4e   :  { %p140_p4 = pnand %p138_p3, %p135_p2 }
  0x50   :  { %143 = shalt.err (!%p140_p4)
}
  0x51   :  { %73 = dma.vmem_to_hbm [thread:$0]  %s71_s11, 64, %s215_s3, [#allocation4]  }
  0x52   :  { %148 = dma.done.wait [#allocation4], 64  }
  0x53   :  { %149 = vsyncadd [#allocation4], 4294967232 }
  0x54   :  { %77 = vsyncpa [#allocation3], 1 }
  0x55   :  { %78 = vsyncpa [#allocation4], 1 }
  0x56   :  { %79 = vsyncpa [#allocation5], 1 }

</bundles_post_ra>
